<compile_context>
chip_gen: v7x
topology: tpu7x:2x2x1
jax: 0.10.0
libtpu: 0.0.40
codegen_flags: <defaults>
</compile_context>

<pallas_src>
import numpy as np
import jax
import jax.numpy as jnp
from jax.experimental import pallas as pl
from jax.experimental.pallas import tpu as pltpu

_LANES = 128


def _round_up(x, m):
    return ((x + m - 1) // m) * m


# --------------------------------------------------------------------------
# Gaussian tap construction (mirrors GaussianBlur.__init__)
# --------------------------------------------------------------------------
def _gaussian_2d_np(radius, sigma=None):
    """Exact reproduction of the module's 2-D kernel (used only for the reference)."""
    sigma = radius / 3 if sigma is None else sigma
    mean = radius
    coords = np.array(
        [[[x - mean, y - mean] for x in range(2 * radius + 1)]
         for y in range(2 * radius + 1)],
        dtype=np.float32,
    )
    k = np.exp(-np.sum(coords ** 2, axis=2) / (2.0 * sigma ** 2))
    k = k / (2.0 * np.pi * sigma ** 2)
    k = k / np.sum(k)
    return k.astype(np.float32)


def _gaussian_1d_np(radius, sigma=None):
    """Normalized 1-D Gaussian; outer(g1d, g1d) == normalized 2-D kernel."""
    sigma = radius / 3 if sigma is None else sigma
    xs = np.arange(2 * radius + 1, dtype=np.float64) - radius
    g = np.exp(-(xs ** 2) / (2.0 * sigma ** 2))
    return (g / g.sum()).astype(np.float32)


def _tile_tap_matrix_np(g1d, tile_w, radius):
    """M[k, j] = g1d[k - j] for 0 <= k - j <= 2r, else 0.  Shape (tile_w+2r, tile_w).

    out_tile_row = in_halo_row @ M, where in_halo_row holds columns
    [c0 - r, c0 + tile_w + r) of the vertically blurred (zero-padded) image.
    The zero band + the wrapper's zero halo columns reproduce conv2d zero padding.
    """
    K = 2 * radius + 1
    M = np.zeros((tile_w + 2 * radius, tile_w), np.float32)
    for j in range(tile_w):
        for d in range(K):
            M[j + d, j] = g1d[d]
    return M


# --------------------------------------------------------------------------
# Pallas kernel
# --------------------------------------------------------------------------
def _make_blur_kernel(taps, B, H, tile_w, radius, n_w_tiles):
    K = 2 * radius + 1
    halo_w = tile_w + 2 * radius

    def kernel(x_ref, mh_ref, o_ref):
        # x_ref : (B, H + 2r, n_w_tiles*tile_w + 2r)  padded input planes (native dtype)
        # mh_ref: (tile_w + 2r, tile_w)               banded horizontal tap matrix
        # o_ref : (B, H, n_w_tiles*tile_w)            lane-dense output planes
        mh = mh_ref[...]                              # load once, reuse for all tiles
        for t in range(n_w_tiles):                    # static unroll over lane tiles
            c0 = t * tile_w                           # 128-aligned lane offset
            # Vertical separable pass (VPU): K sublane-offset slices read straight
            # from the (already padded) input block — no halo scratch, no copy.
            mid = taps[0] * x_ref[:, 0:H, c0:c0 + halo_w].astype(jnp.float32)
            for dy in range(1, K):
                mid = mid + taps[dy] * x_ref[:, dy:dy + H,
                                             c0:c0 + halo_w].astype(jnp.float32)
            # Horizontal separable pass (MXU): one banded tap matmul per lane tile.
            lhs = mid.reshape(B * H, halo_w)
            if mh.dtype == jnp.bfloat16:
                lhs = lhs.astype(jnp.bfloat16)
            out_t = jnp.dot(lhs, mh, preferred_element_type=jnp.float32)
            o_ref[:, :, c0:c0 + tile_w] = out_t.reshape(B, H, tile_w).astype(o_ref.dtype)

    return kernel


# --------------------------------------------------------------------------
# VMEM budgeting / block sizing (generation-aware, full accounting)
# --------------------------------------------------------------------------
def _vmem_budget_bytes():
    try:
        cap = int(pltpu.get_tpu_info().vmem_capacity_bytes)
    except Exception:
        cap = 64 << 20                       # conservative (v7x-sized) fallback
    budget = min(int(0.75 * cap), 96 << 20)  # ~48 MiB on v7x, up to 96 MiB on v5e/v6e
    limit = min(int(0.9 * cap), budget + (16 << 20))
    return budget, limit


def _choose_planes_per_block(P, H, W_in, W_out, tile_w, radius, in_bytes, out_bytes,
                             mh_bytes, budget_bytes, max_planes_per_block=None,
                             min_grid_steps=4):
    """Largest divisor of P that (a) keeps >= min_grid_steps grid steps and
    (b) fits the full VMEM accounting (double-buffered tiles + tap matrix +
    per-tile temporaries) in budget_bytes."""
    H_in = H + 2 * radius
    halo_w = tile_w + 2 * radius
    fixed = 2 * halo_w * tile_w * mh_bytes              # tap matrix, double-buffered
    per_plane = (2 * H_in * W_in * in_bytes              # input tile, double-buffered
                 + 2 * H * W_out * out_bytes             # output tile, double-buffered
                 + H * halo_w * 4                        # per-tile f32 `mid`
                 + H * tile_w * 4)                       # per-tile f32 matmul result
    cap = max(1, P // max(1, min_grid_steps))            # guarantee >= min_grid_steps
    if max_planes_per_block is not None:
        cap = min(cap, max_planes_per_block)
    best = 1
    for b in range(1, cap + 1):
        if P % b == 0 and fixed + b * per_plane <= budget_bytes:
            best = b
    return best


# --------------------------------------------------------------------------
# Wrapper
# --------------------------------------------------------------------------
def gaussian_blur(img, radius, sigma=None, *, tile_w=None, use_bf16_matmul=False,
                  max_planes_per_block=None, min_grid_steps=4):
    """img: (N, 3, H, W) -> blurred (N, 3, H, W); matches F.conv2d(..., groups=3)."""
    N, C, H, W = img.shape
    P = N * C
    r = radius
    K = 2 * r + 1

    # Lane-dense output width and lane-tile size for the horizontal matmul.
    W_out = _round_up(max(W, 1), _LANES)
    if tile_w is None:
        tile_w = next(t for t in (512, 256, 128) if W_out % t == 0)
    assert tile_w % _LANES == 0 and W_out % tile_w == 0
    n_w_tiles = W_out // tile_w
    W_in = W_out + 2 * r
    H_in = H + 2 * r

    g1d = _gaussian_1d_np(radius, sigma)
    mh_dtype = jnp.bfloat16 if use_bf16_matmul else jnp.float32
    mh = jnp.asarray(_tile_tap_matrix_np(g1d, tile_w, r), dtype=mh_dtype)

    # One wrapper-side pad supplies the 2r halo (rows + cols) and the lane-dense
    # width; the kernel then needs no halo scratch and only 128-aligned slices.
    x = img.reshape(P, H, W)                  # depthwise => independent planes
    xp = jnp.pad(x, ((0, 0), (r, r), (r, W_in - W - r)))

    budget, vmem_limit = _vmem_budget_bytes()
    in_bytes = xp.dtype.itemsize
    out_bytes = img.dtype.itemsize
    B = _choose_planes_per_block(P, H, W_in, W_out, tile_w, r, in_bytes, out_bytes,
                                 mh.dtype.itemsize, budget,
                                 max_planes_per_block, min_grid_steps)
    grid = (P // B,)

    halo_w = tile_w + 2 * r
    flops = P * n_w_tiles * (H * halo_w * (2 * K - 1) + 2 * H * halo_w * tile_w)
    bytes_accessed = (xp.size * in_bytes + P * H * W_out * out_bytes
                      + mh.size * mh.dtype.itemsize)

    out = pl.pallas_call(
        _make_blur_kernel([float(v) for v in g1d], B, H, tile_w, r, n_w_tiles),
        out_shape=jax.ShapeDtypeStruct((P, H, W_out), img.dtype),
        grid=grid,
        in_specs=[
            pl.BlockSpec((B, H_in, W_in), lambda i: (i, 0, 0)),
            pl.BlockSpec((halo_w, tile_w), lambda i: (0, 0)),
        ],
        out_specs=pl.BlockSpec((B, H, W_out), lambda i: (i, 0, 0)),
        compiler_params=pltpu.CompilerParams(
            dimension_semantics=("parallel",),
            vmem_limit_bytes=vmem_limit,
        ),
        cost_estimate=pl.CostEstimate(flops=int(flops), transcendentals=0,
                                      bytes_accessed=int(bytes_accessed)),
    )(xp, mh)
    return out[:, :, :W].reshape(N, C, H, W)


# --------------------------------------------------------------------------
# Pure-JAX reference (replicates F.conv2d(img, kernel, padding=r, groups=3))
# --------------------------------------------------------------------------
def _reference_blur(img, radius, sigma=None):
    weights = _gaussian_2d_np(radius, sigma)
    C = img.shape[1]
    w = jnp.asarray(weights)[None, None, :, :]
    w = jnp.tile(w, (C, 1, 1, 1))
    return jax.lax.conv_general_dilated(
        img, w,
        window_strides=(1, 1),
        padding=[(radius, radius), (radius, radius)],
        dimension_numbers=("NCHW", "OIHW", "NCHW"),
        feature_group_count=C,
    )


if __name__ == "__main__":
    radius = 2
    N, C, H, W = 2, 3, 16, 16   # module forward expects 3 channels (groups=3)

    key = jax.random.PRNGKey(0)
    img = jax.random.normal(key, (N, C, H, W), dtype=jnp.float32)
    ref = jax.block_until_ready(_reference_blur(img, radius))

    # 1) Default path: lane-dense 128-wide tile, grid of 6 (>=4 steps).
    out = jax.block_until_ready(gaussian_blur(img, radius))
    assert out.shape == (N, C, H, W)
    assert jnp.max(jnp.abs(out - ref)) < 1e-4

    # 2) Multi-plane blocks (B=3, grid of 2) to exercise the block chooser.
    out2 = jax.block_until_ready(
        gaussian_blur(img, radius, min_grid_steps=2, max_planes_per_block=3))
    assert jnp.max(jnp.abs(out2 - ref)) < 1e-4

    # 3) Width not a multiple of 128 + forced 128-wide lane tiles: exercises the
    #    tiled horizontal matmul path (2 lane tiles) and the ragged right edge.
    W2 = 160
    img2 = jax.random.normal(jax.random.PRNGKey(0), (N, C, H, W2), dtype=jnp.float32)
    ref2 = jax.block_until_ready(_reference_blur(img2, radius))
    out3 = jax.block_until_ready(gaussian_blur(img2, radius, tile_w=128))
    assert jnp.max(jnp.abs(out3 - ref2)) < 1e-4

    # 4) Optional bf16 MXU-operand fast path, validated at a looser tolerance.
    out4 = jax.block_until_ready(gaussian_blur(img, radius, use_bf16_matmul=True))
    assert jnp.max(jnp.abs(out4 - ref)) < 5e-2

    print("KERNEL_OK")
</pallas_src>

<mosaic_0001>
module attributes {stable_mosaic.version = 11 : i64} {
  func.func @kernel(%arg0: i32, %arg1: memref<1x20x132xf32, #tpu.memory_space<vmem>>, %arg2: memref<132x128xf32, #tpu.memory_space<vmem>>, %arg3: memref<1x16x128xf32, #tpu.memory_space<vmem>>) attributes {dimension_semantics = [#tpu.dimension_semantics<parallel>], iteration_bounds = array<i64: 6>, scalar_prefetch = 0 : i64, scratch_operands = 0 : i64, tpu.core_type = #tpu.core_type<tc>, window_params = [{transform_indices = @transform_0, window_bounds = array<i64: 1, 20, 132>}, {pipeline_mode = #tpu.pipeline_mode<synchronous>, transform_indices = @transform_1, window_bounds = array<i64: 132, 128>}, {transform_indices = @transform_2, window_bounds = array<i64: 1, 16, 128>}]} {
    %c0 = arith.constant 0 : index
    %c0_0 = arith.constant 0 : index
    %0 = vector.load %arg2[%c0, %c0_0] : memref<132x128xf32, #tpu.memory_space<vmem>>, vector<132x128xf32>
    %c0_1 = arith.constant 0 : index
    %c0_2 = arith.constant 0 : index
    %c0_3 = arith.constant 0 : index
    %1 = vector.load %arg1[%c0_1, %c0_2, %c0_3] : memref<1x20x132xf32, #tpu.memory_space<vmem>>, vector<1x16x132xf32>
    %cst = arith.constant 0.00664603291 : f32
    %2 = vector.broadcast %cst : f32 to vector<1x16x132xf32>
    %3 = arith.mulf %2, %1 : vector<1x16x132xf32>
    %c0_4 = arith.constant 0 : index
    %c1 = arith.constant 1 : index
    %c0_5 = arith.constant 0 : index
    %4 = vector.load %arg1[%c0_4, %c1, %c0_5] : memref<1x20x132xf32, #tpu.memory_space<vmem>>, vector<1x16x132xf32>
    %cst_6 = arith.constant 0.19422555 : f32
    %5 = vector.broadcast %cst_6 : f32 to vector<1x16x132xf32>
    %6 = arith.mulf %5, %4 : vector<1x16x132xf32>
    %7 = arith.addf %3, %6 : vector<1x16x132xf32>
    %c0_7 = arith.constant 0 : index
    %c2 = arith.constant 2 : index
    %c0_8 = arith.constant 0 : index
    %8 = vector.load %arg1[%c0_7, %c2, %c0_8] : memref<1x20x132xf32, #tpu.memory_space<vmem>>, vector<1x16x132xf32>
    %cst_9 = arith.constant 0.598256826 : f32
    %9 = vector.broadcast %cst_9 : f32 to vector<1x16x132xf32>
    %10 = arith.mulf %9, %8 : vector<1x16x132xf32>
    %11 = arith.addf %7, %10 : vector<1x16x132xf32>
    %c0_10 = arith.constant 0 : index
    %c3 = arith.constant 3 : index
    %c0_11 = arith.constant 0 : index
    %12 = vector.load %arg1[%c0_10, %c3, %c0_11] : memref<1x20x132xf32, #tpu.memory_space<vmem>>, vector<1x16x132xf32>
    %cst_12 = arith.constant 0.19422555 : f32
    %13 = vector.broadcast %cst_12 : f32 to vector<1x16x132xf32>
    %14 = arith.mulf %13, %12 : vector<1x16x132xf32>
    %15 = arith.addf %11, %14 : vector<1x16x132xf32>
    %c0_13 = arith.constant 0 : index
    %c4 = arith.constant 4 : index
    %c0_14 = arith.constant 0 : index
    %16 = vector.load %arg1[%c0_13, %c4, %c0_14] : memref<1x20x132xf32, #tpu.memory_space<vmem>>, vector<1x16x132xf32>
    %cst_15 = arith.constant 0.00664603291 : f32
    %17 = vector.broadcast %cst_15 : f32 to vector<1x16x132xf32>
    %18 = arith.mulf %17, %16 : vector<1x16x132xf32>
    %19 = arith.addf %15, %18 : vector<1x16x132xf32>
    %20 = vector.shape_cast %19 : vector<1x16x132xf32> to vector<16x132xf32>
    %cst_16 = arith.constant dense<0.000000e+00> : vector<16x128xf32>
    %21 = tpu.matmul %20, %0, %cst_16 {dimension_numbers = #tpu.dot_dimension_numbers<[1], [0], [0], [1], [0, 0, 1, 1], [], []>} : vector<16x132xf32>, vector<132x128xf32>, vector<16x128xf32> -> vector<16x128xf32>
    %22 = vector.shape_cast %21 : vector<16x128xf32> to vector<1x16x128xf32>
    %c0_17 = arith.constant 0 : index
    %c0_18 = arith.constant 0 : index
    %c0_19 = arith.constant 0 : index
    %23 = vector.load %arg3[%c0_17, %c0_18, %c0_19] : memref<1x16x128xf32, #tpu.memory_space<vmem>>, vector<1x16x128xf32>
    tpu.vector_store %arg3[%c0_17, %c0_18, %c0_19], %22 {strides = array<i32>} : memref<1x16x128xf32, #tpu.memory_space<vmem>>, vector<1x16x128xf32>,
    return
  }
  func.func @transform_0(%arg0: i32) -> (i32, i32, i32) {
    %c0_i32 = arith.constant 0 : i32
    %c0_i32_0 = arith.constant 0 : i32
    %c0_i32_1 = arith.constant 0 : i32
    return %arg0, %c0_i32, %c0_i32_0 : i32, i32, i32
  }
  func.func @transform_1(%arg0: i32) -> (i32, i32) {
    %c0_i32 = arith.constant 0 : i32
    %c0_i32_0 = arith.constant 0 : i32
    %c0_i32_1 = arith.constant 0 : i32
    return %c0_i32, %c0_i32_0 : i32, i32
  }
  func.func @transform_2(%arg0: i32) -> (i32, i32, i32) {
    %c0_i32 = arith.constant 0 : i32
    %c0_i32_0 = arith.constant 0 : i32
    %c0_i32_1 = arith.constant 0 : i32
    return %arg0, %c0_i32, %c0_i32_0 : i32, i32, i32
  }
}

</mosaic_0001>

<bundles_post_ra>
// kernel: tpu_custom_call.1
= control target key start
LH: loop header
LB: loop body
LE: loop exit
PB: predicated region body
PF: predicated region fallthrough
CT: control target
= control target key end

     0   :  { %7 = vsyncpa [#allocation3], 0  ;;  %s1074_s0 = inlined_call_operand.hbm [shape: f32[6,20,132], index: 0, kind: input, shape index: {}]   ;;  %s1075_s1 = inlined_call_operand.hbm [shape: f32[132,128], index: 1, kind: input, shape index: {}]   ;;  %s1076_s2 = inlined_call_operand.hbm [shape: f32[6,16,128], index: 2, kind: output, shape index: {}]  }
   0x1   :  { %9 = vsyncpa [#allocation3 + $0x1], 0 }
   0x2   :  { %10 = vsyncpa [#allocation6], 0 }
   0x3   :  { %11 = vsyncpa [#allocation4], 0 }
   0x4   :  { %13 = vsyncpa [#allocation4 + $0x1], 0  ;;  %s803_s9 = smov 0   ;;  %s805_s10 = smov 0  }
   0x5   :  { %s807_s11 = smov 0   ;;  %s809_s12 = smov 0  }
   0x6 LB: > { %s824_s13 = sadd.s32 4294967295, %s775_s12   ;;  %s520_s14 = sadd.s32 4294967294, %s775_s12   ;;  %s775_s12 = sphi %s809_s12, %s1095_s12   ;;  %s771_s11 = sphi %s807_s11, %s1094_s11   ;;  %s767_s10 = sphi %s805_s10, %s1093_s10   ;;  %s763_s9 = sphi %s803_s9, %s1092_s9  }
   0x7   : > { %p39_p0 = scmp.ne.s32.totalorder %s767_s10, %s763_s9  ;;  %p1077_p1 = scmp.eq.s32.totalorder %s824_s13, 0 }
   0x8   : > { %p90_p3 = scmp.eq.s32.totalorder %s520_s14, 5  ;;  %p521_p5 = scmp.ge.s32.totalorder %s775_s12, 1 }
   0x9   : > { %p833_p4 = por %p1077_p1, %p39_p0  ;;  %p97_p7 = scmp.lt.s32.totalorder %s775_s12, 7 }
   0xa   : > { %p838_p6 = por %p90_p3, %p39_p0  ;;  %s777_s18 = smov [#allocation5]  }
   0xb   : > { %s1080_s15 = scalar_select %p833_p4, 1, 0 }
   0xc   : > { %s1081_s16 = scalar_select %p838_p6, 1, 0 }
   0xd   : > { %p843_p8 = pnand %p521_p5, %p97_p7  ;;  %s109_s19 = sshll.u32 %s777_s18, 4  ;;  %s110_s19 = int_to_ptr.vmem [resolvable:$true] %s109_s19 }
   0xe   : > { %s856_s21 = sadd.s32 1, %s775_s12   ;;  %s26_s22 = sadd.s32 1, %s771_s11 }
   0xf   : > { %s1082_s17 = scalar_select %p843_p8, 1, 0 }
  0x10   : > { %p590_p9 = pneg %p843_p8  ;;  %s23_s23 = ssub.s32 %s775_s12, %s856_s21 }
  0x11   : > { %s647_s26 = scalar_lea.hbm %s1075_s1, 2176 }
  0x12   : > { %p851_p10 = pnand %p590_p9, %p1077_p1  ;;  %p648_p11 = scmp.ne.s32.totalorder %s1075_s1, %s647_s26 }
  0x13   : > { %p654_p3 = scmp.lt.u32.totalorder %s647_s26, %s1075_s1 }
  0x14   : > { %p649_p12 = pneg %p851_p10 }
  0x16   : > { %p650_p13 = pnand %p649_p12, %p648_p11 }
  0x18   : > { %p651_p0 = pneg %p650_p13 }
  0x1a   : > { %p656_p5 = pnand %p654_p3, %p651_p0 }
  0x1c   : > { %659 = shalt.err (!%p656_p5)
}
  0x1d   : > { %s660_s3 = scalar_lea.vmem %s110_s19, 2176  ;;  %p668_p2 = scmp.lt.s32.totalorder %s110_s19, %s110_s19 }
  0x1e   : > { %p661_p7 = scmp.ne.s32.totalorder %s110_s19, %s660_s3  ;;  %p669_p6 = scmp.lt.s32.totalorder %s660_s3, %s660_s3 }
  0x20   : > { %p663_p9 = pnand %p661_p7, %p649_p12  ;;  %p670_p4 = por %p669_p6, %p668_p2 }
  0x22   : > { %p664_p1 = pneg %p663_p9 }
  0x24   : > { %p671_p8 = pnand %p670_p4, %p664_p1 }
  0x26   : > { %674 = shalt.err (!%p671_p8)
}
  0x27   : > { %s778_s4 = smov 128   ;;  %s779_s5 = smov 8  }
  0x28   : > { %593 = dma.hbm_to_vmem [thread:$0]  (!%p851_p10), %s1075_s1, 2176, %s110_s19, [#allocation6], %s778_s4, %s778_s4, %s779_s5  }
  0x29   : > { %p24_p11 = scmp.eq.s32.totalorder %s23_s23, 0  ;;  %p33_p2 = scmp.ne.s32.totalorder %s771_s11, %s767_s10 }
  0x2a   : > { %p34_p1 = scmp.eq.s32.totalorder %s775_s12, 0  ;;  %p603_p4 = scmp.lt.s32.totalorder %s775_s12, 6 }
  0x2b   : > { %s882_s8 = scalar_select %p24_p11, %s771_s11, %s26_s22  }
  0x2c   : > { %p35_p6 = por %p34_p1, %p33_p2  ;;  %p1084_p8 = scmp.eq.s32.totalorder %s824_s13, 5 }
  0x2d   : > { %s123_s18 = sand.u32 1, %s771_s11   ;;  %s580_s24 = smul.u32 768, %s775_s12 }
  0x2e   : > { %p886_p12 = por %p1084_p8, %p33_p2  ;;  %s579_s25 = smul.u32 48, %s123_s18 }
  0x2f   : > { %s895_s27 = scalar_lea.hbm %s1074_s0, %s580_s24  ;;  %p897_p10 = pnand %p603_p4, %p35_p6 }
  0x30   : > { %s127_s22 = scalar_lea.vmem [#allocation2], %s579_s25  ;;  %s903_s28 = scalar_lea.sflag [#allocation3], %s123_s18 }
  0x31   : > { %s134_s23 = sshll.u32 %s127_s22, 4  ;;  %s675_s29 = scalar_lea.hbm %s895_s27, 768  ;;  %s901_s23 = int_to_ptr.vmem [resolvable:$true] %s134_s23 }
  0x32   : > { %p676_p13 = scmp.ne.s32.totalorder %s895_s27, %s675_s29  ;;  %p677_p0 = pneg %p897_p10 }
  0x33   : > { %s680_s4 = scalar_lea.hbm %s1074_s0, 4608  ;;  %p681_p7 = scmp.lt.u32.totalorder %s895_s27, %s1074_s0 }
  0x34   : > { %p678_p3 = pnand %p677_p0, %p676_p13  ;;  %p682_p9 = scmp.lt.u32.totalorder %s680_s4, %s675_s29 }
  0x35   : > { %p684_p2 = scmp.lt.u32.totalorder %s675_s29, %s895_s27 }
  0x36   : > { %p679_p5 = pneg %p678_p3  ;;  %p683_p11 = por %p682_p9, %p681_p7 }
  0x38   : > { %p685_p1 = por %p684_p2, %p683_p11 }
  0x3a   : > { %p686_p4 = pnand %p685_p1, %p679_p5 }
  0x3c   : > { %689 = shalt.err (!%p686_p4)
}
  0x3d   : > { %s690_s7 = scalar_lea.vmem %s901_s23, 768  ;;  %s780_s18 = smov [#allocation2]  }
  0x3e   : > { %p691_p6 = scmp.ne.s32.totalorder %s901_s23, %s690_s7  ;;  %s695_s24 = sshll.u32 %s780_s18, 4  ;;  %s696_s24 = int_to_ptr.vmem [resolvable:$false] %s695_s24 }
  0x3f   : > { %s697_s25 = scalar_lea.vmem %s696_s24, 1536  ;;  %p698_p3 = scmp.lt.s32.totalorder %s901_s23, %s696_s24 }
  0x40   : > { %p693_p8 = pnand %p691_p6, %p677_p0  ;;  %p699_p7 = scmp.lt.s32.totalorder %s697_s25, %s690_s7 }
  0x42   : > { %p694_p13 = pneg %p693_p8  ;;  %p700_p9 = por %p699_p7, %p698_p3 }
  0x44   : > { %p701_p11 = pnand %p700_p9, %p694_p13 }
  0x46   : > { %704 = shalt.err (!%p701_p11)
}
  0x47   : > { %s781_s20 = smov 256   ;;  %s782_s26 = smov 16  }
  0x48   : > { %597 = dma.hbm_to_vmem [thread:$0]  (!%p897_p10), %s895_s27, 768, %s901_s23, %s903_s28, %s781_s20, %s781_s20, %s782_s26  }
  0x49   : > { %p1087_p0 = scmp.ne.s32.totalorder %s1082_s17, 0 }
  0x4a   : > { %s934_s22 = sand.u32 (!%p1087_p0), 1, %s767_s10   ;;  %p1088_p5 = scmp.ne.s32.totalorder (!%p1087_p0), %s1080_s15, 0 }
  0x4b   : > { %146 = sbr.rel (%p1087_p0) target bundleno = 349 (0x15d), region = 28  ;;  %s149_s30 = scalar_lea.sflag (!%p1087_p0), [#allocation3], %s934_s22 }
  0x4c   : > { %s581_s29 = smul.u32 (!%p1087_p0), 48, %s934_s22 }
  0x4e   : > { %s938_s3 = scalar_lea.vmem (!%p1087_p0), [#allocation2], %s581_s29 }
  0x52   : > { %750 = dma.done.wait (%p1088_p5), %s149_s30, 768  }
  0x53   : > { %752 = vsyncadd (%p1088_p5), %s149_s30, 4294966528  ;;  %p1089_p10 = scmp.eq.s32.totalorder %s824_s13, 0 }
  0x55   : > { %754 = dma.done.wait (%p1089_p10), [#allocation6], 2176   ;;  %p1090_p2 = pmov %p1089_p10 }
  0x56   : > { %v783_v0 = vmov 0.0|0.0   ;;  %v177_v1 = vld [vmem:[#allocation5] sm:$0xff]  ;;  %v178_v2 = vld [vmem:[#allocation5 + $0x8] sm:$0xff]  ;;  %v179_v3 = vld [vmem:[#allocation5 + $0x10] sm:$0xff]  ;;  %vm317_vm0 = vcmask 1043456   ;;  %vm218_vm1 = vcmask 1046528  }
  0x57   : > { %756 = vsyncadd (%p1090_p2), [#allocation6], 4294965120  ;;  %537 = vmatprep.subr.bf16.mxu0 %v783_v0  ;;  %561 = vmatprep.subr.bf16.mxu1 %v783_v0  ;;  %v538_v4 = vpack.c.bf16 %v178_v2, %v177_v1  ;;  %v180_v5 = vld [vmem:[#allocation5 + $0x18] sm:$0xff]  ;;  %v181_v7 = vld [vmem:[#allocation5 + $0x20] sm:$0xff]  ;;  %vm253_vm2 = vcmask 1045504   ;;  %vm284_vm3 = vcmask 1044480  }
  0x58   : > { %v541_v6 = vpack.c.bf16 %v180_v5, %v179_v3  ;;  %v182_v8 = vld [vmem:[#allocation5 + $0x28] sm:$0xff]  ;;  %v183_v9 = vld [vmem:[#allocation5 + $0x30] sm:$0xff]  ;;  %v184_v11 = vld [vmem:[#allocation5 + $0x38] sm:$0xff]  ;;  %vm336_vm4 = vcmask 31744   ;;  %s527_s15 = sshll.u32 %s934_s22, 4  ;;  %s536_s19 = sshll.u32 %s824_s13, 8 }
  0x59   : > { %539 = vmatpush1.bf16.msra.mxu0 %v538_v4  ;;  %570 = vmatpush1.bf16.msra.mxu1 %v538_v4  ;;  %v195_v10 = vld [vmem:[%s938_s3 + $0x8] sm:$0xff]  ;;  %v197_v12 = vld [vmem:[%s938_s3 + $0x18] sm:$0xff]  ;;  %v544_v15 = vpack.c.bf16 %v182_v8, %v181_v7  ;;  %v185_v16 = vld [vmem:[#allocation5 + $0x40] sm:$0xff]  ;;  %v547_v28 = vpack.c.bf16 %v184_v11, %v183_v9  ;;  %s176_s17 = scalar_lea.vmem [#allocation7], %s527_s15  ;;  %s1031_s4 = scalar_lea.hbm %s1076_s2, %s536_s19 }
  0x5a   : > { %540 = vmatprep.subr.bf16.mxu0 %v783_v0  ;;  %562 = vmatprep.subr.bf16.mxu1 %v783_v0  ;;  %v199_v13 = vmul.f32 0.006646033, %v195_v10  ;;  %v203_v14 = vld [vmem:[%s938_s3 + $0x8] sm:$0xfe]  ;;  %v955_v18 = vmul.f32 0.006646033, %v197_v12 }
  0x5b   : > { %v186_v17 = vld [vmem:[#allocation5 + $0x48] sm:$0xff]  ;;  %v207_v19 = vmul.f32 0.19422555, %v203_v14  ;;  %v957_v20 = vmul.f32 0.19422555, %v197_v12  ;;  %v194_v33 = vld [vmem:[%s938_s3] sm:$0xff] }
  0x5c   : > { %v238_v21 = vld [vmem:[%s938_s3 + $0x8] sm:$0xfc]  ;;  %v244_v22 = vmul.f32 0.5982568, %v197_v12  ;;  %v322_v32 = vrot.slane %v955_v18, 4  ;;  %v550_v39 = vpack.c.bf16 %v186_v17, %v185_v16  ;;  %v187_v44 = vld [vmem:[#allocation5 + $0x50] sm:$0xff] }
  0x5d   : > { %542 = vmatpush1.bf16.msra.mxu0 %v541_v6  ;;  %571 = vmatpush1.bf16.msra.mxu1 %v541_v6  ;;  %v273_v23 = vld [vmem:[%s938_s3 + $0x8] sm:$0xf8]  ;;  %v222_v24 = vrot.slane %v207_v19, 1  ;;  %v223_v25 = vrot.slane %v957_v20, 1  ;;  %v242_v26 = vmul.f32 0.5982568, %v238_v21 }
  0x5e   : > { %543 = vmatprep.subr.bf16.mxu0 %v783_v0  ;;  %563 = vmatprep.subr.bf16.mxu1 %v783_v0  ;;  %v277_v27 = vmul.f32 0.19422555, %v273_v23  ;;  %v258_v29 = vrot.slane %v244_v22, 2  ;;  %v289_v30 = vrot.slane %v957_v20, 3  ;;  %v304_v31 = vld [vmem:[%s938_s3 + $0x8] sm:$0xf0] }
  0x5f   : > { %v224_v34 = vsel %vm218_vm1, %v222_v24, %v223_v25  ;;  %v257_v35 = vrot.slane %v242_v26, 2  ;;  %v308_v37 = vmul.f32 0.006646033, %v304_v31  ;;  %v205_v38 = vld [vmem:[%s938_s3 + $0x28] sm:$0x1]  ;;  %v196_v54 = vld [vmem:[%s938_s3 + $0x10] sm:$0xff] }
  0x60   : > { %v288_v36 = vrot.slane %v277_v27, 3  ;;  %v234_v40 = vadd.f32 %v224_v34, %v199_v13  ;;  %v211_v41 = vmul.f32 0.19422555, %v205_v38  ;;  %v240_v42 = vld [vmem:[%s938_s3 + $0x28] sm:$0x3]  ;;  %v189_v3 = vld [vmem:[#allocation5 + $0x60] sm:$0xff] }
  0x61   : > { %545 = vmatpush1.bf16.msra.mxu0 %v544_v15  ;;  %572 = vmatpush1.bf16.msra.mxu1 %v544_v15  ;;  %v275_v43 = vld [vmem:[%s938_s3 + $0x28] sm:$0x7]  ;;  %v259_v45 = vsel %vm253_vm2, %v257_v35, %v258_v29  ;;  %v321_v47 = vrot.slane %v308_v37, 4  ;;  %v246_v48 = vmul.f32 0.5982568, %v240_v42  ;;  %s437_s27 = sshll.u32 %s176_s17, 4  ;;  %s1026_s27 = int_to_ptr.vmem [resolvable:$true] %s437_s27 }
  0x62   : > { %546 = vmatprep.subr.bf16.mxu0 %v783_v0  ;;  %564 = vmatprep.subr.bf16.mxu1 %v783_v0  ;;  %v290_v46 = vsel %vm284_vm3, %v288_v36, %v289_v30  ;;  %v306_v49 = vld [vmem:[%s938_s3 + $0x28] sm:$0xf]  ;;  %v269_v50 = vadd.f32 %v259_v45, %v234_v40  ;;  %v227_v51 = vrot.slane %v211_v41, 1  ;;  %v279_v52 = vmul.f32 0.19422555, %v275_v43  ;;  %s424_s5 = scalar_lea.sflag [#allocation4], %s934_s22 }
  0x63   : > { %v310_v53 = vmul.f32 0.006646033, %v306_v49  ;;  %v188_v55 = vld [vmem:[#allocation5 + $0x58] sm:$0xff]  ;;  %v323_v56 = vsel %vm317_vm0, %v321_v47, %v322_v32  ;;  %v262_v57 = vrot.slane %v246_v48, 2  ;;  %v198_v58 = vmul.f32 0.006646033, %v194_v33 }
  0x64   : > { %v981_v59 = vmul.f32 0.006646033, %v196_v54  ;;  %v300_v60 = vadd.f32 %v290_v46, %v269_v50  ;;  %v228_v61 = vsel %vm218_vm1, %v223_v25, %v227_v51  ;;  %v293_v62 = vrot.slane %v279_v52, 3  ;;  %v202_v1 = vld [vmem:[%s938_s3] sm:$0xfe]  ;;  %v190_v4 = vld [vmem:[#allocation5 + $0x68] sm:$0xff] }
  0x65   : > { %548 = vmatpush1.bf16.msra.mxu0 %v547_v28  ;;  %573 = vmatpush1.bf16.msra.mxu1 %v547_v28  ;;  %v326_v63 = vrot.slane %v310_v53, 4  ;;  %v237_v2 = vld [vmem:[%s938_s3] sm:$0xfc]  ;;  %v236_v5 = vadd.f32 %v228_v61, %v955_v18  ;;  %v263_v6 = vsel %vm253_vm2, %v258_v29, %v262_v57  ;;  %v206_v7 = vmul.f32 0.19422555, %v202_v1  ;;  %v192_v40 = vld [vmem:[#allocation5 + $0x78] sm:$0xff] }
  0x66   : > { %549 = vmatprep.subr.bf16.mxu0 %v783_v0  ;;  %565 = vmatprep.subr.bf16.mxu1 %v783_v0  ;;  %v990_v8 = vmul.f32 0.19422555, %v196_v54  ;;  %v272_v9 = vld [vmem:[%s938_s3] sm:$0xf8]  ;;  %v553_v10 = vpack.c.bf16 %v188_v55, %v187_v44  ;;  %v333_v11 = vadd.f32 %v323_v56, %v300_v60  ;;  %v294_v12 = vsel %vm284_vm3, %v289_v30, %v293_v62  ;;  %v204_v15 = vld [vmem:[%s938_s3 + $0x20] sm:$0x1] }
  0x67   : > { %v241_v13 = vmul.f32 0.5982568, %v237_v2  ;;  %v303_v14 = vld [vmem:[%s938_s3] sm:$0xf0]  ;;  %v271_v16 = vadd.f32 %v263_v6, %v236_v5  ;;  %v219_v17 = vrot.slane %v206_v7, 1  ;;  %v327_v22 = vsel %vm317_vm0, %v322_v32, %v326_v63  ;;  %s705_s6 = scalar_lea.vmem %s1026_s27, 256 }
  0x68   : > { %v220_v19 = vrot.slane %v990_v8, 1  ;;  %v243_v20 = vmul.f32 0.5982568, %v196_v54  ;;  %v239_v21 = vld [vmem:[%s938_s3 + $0x20] sm:$0x3]  ;;  %529 = vmatprep.mubr.msk.f32.mxu0 %vm336_vm4, %v333_v11  ;;  %v286_v29 = vrot.slane %v990_v8, 3  ;;  %v556_v31 = vpack.c.bf16 %v190_v4, %v189_v3  ;;  %p706_p1 = scmp.ne.s32.totalorder %s1026_s27, %s705_s6 }
  0x69   : > { %551 = vmatpush1.bf16.msra.mxu0 %v550_v39  ;;  %574 = vmatpush1.bf16.msra.mxu1 %v550_v39  ;;  %v254_v23 = vrot.slane %v241_v13, 2  ;;  %v276_v24 = vmul.f32 0.19422555, %v272_v9  ;;  %v307_v25 = vmul.f32 0.006646033, %v303_v14  ;;  %v302_v26 = vadd.f32 %v294_v12, %v271_v16  ;;  %v191_v39 = vld [vmem:[#allocation5 + $0x70] sm:$0xff] }
  0x6a   : > { %552 = vmatprep.subr.bf16.mxu0 %v783_v0  ;;  %566 = vmatprep.subr.bf16.mxu1 %v783_v0  ;;  %v221_v27 = vsel %vm218_vm1, %v219_v17, %v220_v19  ;;  %v255_v28 = vrot.slane %v243_v20, 2  ;;  %v274_v30 = vld [vmem:[%s938_s3 + $0x20] sm:$0x7]  ;;  %v210_v35 = vmul.f32 0.19422555, %v204_v15  ;;  %v319_v43 = vrot.slane %v981_v59, 4  ;;  %p707_p4 = pnand %p706_p1, %p886_p12 }
  0x6b   : > { %v233_v33 = vadd.f32 %v221_v27, %v198_v58  ;;  %v285_v34 = vrot.slane %v276_v24, 3  ;;  %v305_v36 = vld [vmem:[%s938_s3 + $0x20] sm:$0xf]  ;;  %v335_v18 = vadd.f32 %v327_v22, %v302_v26  ;;  %v245_v37 = vmul.f32 0.5982568, %v239_v21  ;;  %s785_s13 = smov [#allocation7]  }
  0x6c   : > { %v256_v32 = vsel %vm253_vm2, %v254_v23, %v255_v28  ;;  %v278_v38 = vmul.f32 0.19422555, %v274_v30  ;;  %v318_v42 = vrot.slane %v307_v25, 4  ;;  %v225_v44 = vrot.slane %v210_v35, 1  ;;  %v193_v61 = vld [vmem:[#allocation5 + $0x80] sm:$0xf]  ;;  %p708_p6 = pneg %p707_p4 }
  0x6d   : > { %554 = vmatpush1.bf16.msra.mxu0 %v553_v10  ;;  %575 = vmatpush1.bf16.msra.mxu1 %v553_v10  ;;  %v268_v41 = vadd.f32 %v256_v32, %v233_v33  ;;  %v287_v45 = vsel %vm284_vm3, %v285_v34, %v286_v29  ;;  %v260_v46 = vrot.slane %v245_v37, 2  ;;  %v309_v48 = vmul.f32 0.006646033, %v305_v36  ;;  %s709_s7 = sshll.u32 %s785_s13, 4  ;;  %s710_s7 = int_to_ptr.vmem [resolvable:$false] %s709_s7 }
  0x6e   : > { %555 = vmatprep.subr.bf16.mxu0 %v783_v0  ;;  %567 = vmatprep.subr.bf16.mxu1 %v783_v0  ;;  %v291_v47 = vrot.slane %v278_v38, 3  ;;  %v226_v49 = vsel %vm218_vm1, %v220_v19, %v225_v44  ;;  %v559_v50 = vpack.c.bf16 %v192_v40, %v191_v39  ;;  %v320_v56 = vsel %vm317_vm0, %v318_v42, %v319_v43  ;;  %s711_s18 = scalar_lea.vmem %s710_s7, 512  ;;  %p712_p8 = scmp.lt.s32.totalorder %s1026_s27, %s710_s7 }
  0x6f   : > { %530 = vmatprep.mubr.msk.f32.mxu1 %vm336_vm4, %v335_v18  ;;  %v235_v51 = vadd.f32 %v226_v49, %v981_v59  ;;  %v261_v52 = vsel %vm253_vm2, %v255_v28, %v260_v46  ;;  %v324_v53 = vrot.slane %v309_v48, 4  ;;  %v299_v54 = vadd.f32 %v287_v45, %v268_v41  ;;  %p713_p13 = scmp.lt.s32.totalorder %s711_s18, %s705_s6 }
  0x70   : > { %v292_v55 = vsel %vm284_vm3, %v286_v29, %v291_v47  ;;  %v784_v60 = vmov 0.0  }
  0x71   : > { %557 = vmatpush1.bf16.msra.mxu0 %v556_v31  ;;  %576 = vmatpush1.bf16.msra.mxu1 %v556_v31  ;;  %v270_v57 = vadd.f32 %v261_v52, %v235_v51  ;;  %v325_v58 = vsel %vm317_vm0, %v319_v43, %v324_v53  ;;  %v332_v62 = vadd.f32 %v320_v56, %v299_v54  ;;  %p714_p3 = por %p713_p13, %p712_p8 }
  0x72   : > { %558 = vmatprep.subr.bf16.mxu0 %v783_v0  ;;  %568 = vmatprep.subr.bf16.mxu1 %v783_v0 }
  0x73   : > { %v301_v59 = vadd.f32 %v292_v55, %v270_v57  ;;  %p715_p7 = pnand %p714_p3, %p708_p6 }
  0x75   : > { %560 = vmatpush1.bf16.msra.mxu0 %v559_v50  ;;  %577 = vmatpush1.bf16.msra.mxu1 %v559_v50  ;;  %v334_v63 = vadd.f32 %v325_v58, %v301_v59 }
  0x76   : > { %378 = vmatprep.subr.mxu0 %v784_v60  ;;  %569 = vmatprep.subr.mxu1 %v784_v60 }
  0x79   : > { %528 = vmatpush1.msk.msra.mxu0 %vm317_vm0, %v193_v61  ;;  %578 = vmatpush1.msk.msra.mxu1 %vm317_vm0, %v193_v61 }
  0x7a   : > { %411 = vmatmul.mubr.f32.vlgmr.msra.gmra.mrb[0].mxu0 %v332_v62  ;;  %416 = vmatmul.mubr.f32.vlgmr.msra.gmra.mrb[0].mxu1 %v334_v63 }
 0x14d   : > { %v412_v0 = vpop.f32.mrb[0].mxu0  ;;  %v417_v1 = vpop.f32.mrb[0].mxu1 }
 0x14e   : > { %421 = vst [vmem:[%s176_s17] sm:$0xff] %v412_v0  ;;  %422 = vst [vmem:[%s176_s17 + $0x8] sm:$0xff] %v417_v1  ;;  %v414_v2 = vpop.f32.mrb[1].mxu0  ;;  %v419_v3 = vpop.f32.mrb[1].mxu1 }
 0x14f   : > { %718 = shalt.err (!%p715_p7)
}
 0x150   : > { %s719_s24 = scalar_lea.hbm %s1031_s4, 256  ;;  %s723_s26 = scalar_lea.hbm %s1076_s2, 1536 }
 0x151   : > { %p720_p9 = scmp.ne.s32.totalorder %s1031_s4, %s719_s24  ;;  %p724_p5 = scmp.lt.u32.totalorder %s1031_s4, %s1076_s2 }
 0x152   : > { %p725_p10 = scmp.lt.u32.totalorder %s723_s26, %s719_s24  ;;  %p727_p1 = scmp.lt.u32.totalorder %s719_s24, %s1031_s4 }
 0x153   : > { %p721_p11 = pnand %p720_p9, %p886_p12 }
 0x154   : > { %p726_p2 = por %p725_p10, %p724_p5 }
 0x155   : > { %p722_p0 = pneg %p721_p11 }
 0x156   : > { %p728_p4 = por %p727_p1, %p726_p2 }
 0x158   : > { %p729_p6 = pnand %p728_p4, %p722_p0 }
 0x15a   : > { %732 = shalt.err (!%p729_p6)
}
 0x15b   : > { %s786_s3 = smov 128   ;;  %s787_s15 = smov 8  }
 0x15c   : > { %588 = dma.vmem_to_hbm [thread:$0]  (%p886_p12), %s1026_s27, 256, %s1031_s4, %s424_s5, %s786_s3, %s786_s3, %s787_s15  }
 0x15d PF: > { %p605_p8 = scmp.ge.s32.totalorder %s775_s12, 2  ;;  %s452_s17 = sand.u32 1, %s763_s9  }
 0x15e   : > { %p1091_p13 = scmp.ne.s32.totalorder %s1081_s16, 0  ;;  %s453_s19 = scalar_lea.sflag [#allocation4], %s452_s17 }
 0x160   : > { %p599_p3 = pnand %p605_p8, %p1091_p13 }
 0x162   : > { %758 = dma.done.wait (!%p599_p3), %s453_s19, 256  }
 0x163   : > { %760 = vsyncadd (!%p599_p3), %s453_s19, 4294967040  ;;  %p16_p7 = scmp.ge.s32.totalorder %s856_s21, 8   ;;  %s1092_s9 = smov %s767_s10 }
 0x164   : > { %s1093_s10 = smov %s771_s11  ;;  %s1094_s11 = smov %s882_s8 }
 0x165   : > { %s1095_s12 = smov %s856_s21  ;;  %18 = sbr.rel (!%p16_p7) target bundleno = 6 (0x6), region = 77 }
 0x16c   :  { %458 = vsyncpa [#allocation3], 1 }
 0x16d   :  { %460 = vsyncpa [#allocation3 + $0x1], 1 }
 0x16e   :  { %461 = vsyncpa [#allocation6], 1 }
 0x16f   :  { %462 = vsyncpa [#allocation4], 1 }
 0x170   :  { %464 = vsyncpa [#allocation4 + $0x1], 1 }

</bundles_post_ra>
